<compile_context>
chip_gen: v5e
topology: v5e:2x2
jax: 0.10.0
libtpu: 0.0.40
codegen_flags: <defaults>
</compile_context>

<pallas_src>
import math

import jax
import jax.numpy as jnp
from jax.experimental import pallas as pl
from jax.experimental.pallas import tpu as pltpu


# --------------------------------------------------------------------------- #
# PE table (equivalent to the PyTorch registered buffer, built once)
# --------------------------------------------------------------------------- #
def make_pe_table(seq_len, d_model):
    """Returns the (seq_len, d_model) float32 positional-encoding table."""
    position = jnp.arange(seq_len, dtype=jnp.float32)[:, None]               # (S, 1)
    div_term = jnp.exp(
        jnp.arange(0, d_model, 2, dtype=jnp.float32) * (-math.log(10000.0) / d_model)
    )                                                                        # (D/2,)
    angles = position * div_term                                             # (S, D/2)
    pe = jnp.zeros((seq_len, d_model), dtype=jnp.float32)
    pe = pe.at[:, 0::2].set(jnp.sin(angles))
    pe = pe.at[:, 1::2].set(jnp.cos(angles))
    return pe


# --------------------------------------------------------------------------- #
# Kernel: fused elementwise add of the resident PE tile
# --------------------------------------------------------------------------- #
def _pe_add_kernel(x_ref, pe_ref, o_ref):
    # x_ref / o_ref: (tS, D) (batch dim squeezed), pe_ref: (tS, D) float32.
    # Add in f32, cast once at the store (matches PyTorch numerics for bf16 x).
    o_ref[...] = (x_ref[...].astype(jnp.float32) + pe_ref[...]).astype(o_ref.dtype)


def _choose_seq_tile(S, D, itemsize, target_bytes=2 * 1024 * 1024):
    """Largest multiple-of-8 row tile that divides S and stays ~target_bytes."""
    max_rows = max(8, target_bytes // max(1, D * itemsize))
    if S <= max_rows:
        return S
    tS = max(8, (max_rows // 8) * 8)
    while S % tS != 0 and tS > 8:
        tS -= 8
    if S % tS != 0:
        # Ragged sequence length with no small multiple-of-8 divisor:
        # fall back to the full sequence as one block.
        return S
    return tS


def positional_encoding_add(x, pe=None):
    """x: (B, S, D) -> x + pe[:S]   (pe optionally precomputed, shape (>=S, D))."""
    B, S, D = x.shape
    if pe is None:
        pe = make_pe_table(S, D)
    else:
        pe = pe[:S].astype(jnp.float32)

    # NOTE: for D not a multiple of 128 one would reshape to a lane-dense flat
    # layout in the wrapper; d_model = 512 here, so the output is already dense.
    tS = _choose_seq_tile(S, D, jnp.dtype(x.dtype).itemsize)
    num_s_tiles = S // tS

    # grid = (sequence tiles, batch).  Batch is the INNER axis so the pe tile's
    # block index is constant across consecutive steps -> stays VMEM-resident.
    grid = (num_s_tiles, B)

    return pl.pallas_call(
        _pe_add_kernel,
        out_shape=jax.ShapeDtypeStruct((B, S, D), x.dtype),
        grid_spec=pltpu.PrefetchScalarGridSpec(
            num_scalar_prefetch=0,
            grid=grid,
            in_specs=[
                # x block: (1-squeezed, tS, D); kernel sees (tS, D)
                pl.BlockSpec((None, tS, D), lambda si, b: (b, si, 0)),
                # pe block: constant over the inner (batch) axis -> no re-DMA
                pl.BlockSpec((tS, D), lambda si, b: (si, 0)),
            ],
            out_specs=pl.BlockSpec((None, tS, D), lambda si, b: (b, si, 0)),
        ),
        compiler_params=pltpu.CompilerParams(
            dimension_semantics=("parallel", "parallel"),
            vmem_limit_bytes=48 * 1024 * 1024,
        ),
    )(x, pe)


# --------------------------------------------------------------------------- #
# Pure-JAX reference (mirrors the PyTorch module)
# --------------------------------------------------------------------------- #
def _reference_pe_add(x):
    B, S, D = x.shape
    pe = make_pe_table(S, D)
    return (x.astype(jnp.float32) + pe[None, :, :]).astype(x.dtype)


if __name__ == "__main__":
    key = jax.random.PRNGKey(0)

    # Small shapes consistent with the module: batch=2, seq=8, d_model=512.
    B, S, D = 2, 8, 512
    x = jax.random.normal(key, (B, S, D), dtype=jnp.float32)

    out = positional_encoding_add(x)
    out = jax.block_until_ready(out)
    ref = _reference_pe_add(x)
    assert out.shape == (B, S, D)
    assert jnp.allclose(out, ref, atol=1e-5, rtol=1e-5), "mismatch vs reference (small)"

    # Larger shape exercising the sequence-tiling path (grid = (2, 2)).
    B2, S2, D2 = 2, 2048, 512
    x2 = jax.random.normal(jax.random.PRNGKey(1), (B2, S2, D2), dtype=jnp.float32)
    out2 = jax.block_until_ready(positional_encoding_add(x2))
    ref2 = _reference_pe_add(x2)
    assert jnp.allclose(out2, ref2, atol=1e-5, rtol=1e-5), "mismatch vs reference (tiled)"

    print("KERNEL_OK")
</pallas_src>

<mosaic_0001>
module attributes {stable_mosaic.version = 11 : i64} {
  func.func @_pe_add_kernel(%arg0: i32, %arg1: i32, %arg2: memref<1x8x512xf32, #tpu.memory_space<vmem>>, %arg3: memref<8x512xf32, #tpu.memory_space<vmem>>, %arg4: memref<1x8x512xf32, #tpu.memory_space<vmem>>) attributes {dimension_semantics = [#tpu.dimension_semantics<parallel>, #tpu.dimension_semantics<parallel>], iteration_bounds = array<i64: 1, 2>, scalar_prefetch = 0 : i64, scratch_operands = 0 : i64, tpu.core_type = #tpu.core_type<tc>, window_params = [{transform_indices = @transform_0, window_bounds = array<i64: 1, 8, 512>}, {transform_indices = @transform_1, window_bounds = array<i64: 8, 512>}, {transform_indices = @transform_2, window_bounds = array<i64: 1, 8, 512>}]} {
    %c0 = arith.constant 0 : index
    %c0_0 = arith.constant 0 : index
    %c0_1 = arith.constant 0 : index
    %0 = vector.load %arg2[%c0, %c0_0, %c0_1] : memref<1x8x512xf32, #tpu.memory_space<vmem>>, vector<1x8x512xf32>
    %1 = vector.shape_cast %0 : vector<1x8x512xf32> to vector<8x512xf32>
    %c0_2 = arith.constant 0 : index
    %c0_3 = arith.constant 0 : index
    %2 = vector.load %arg3[%c0_2, %c0_3] : memref<8x512xf32, #tpu.memory_space<vmem>>, vector<8x512xf32>
    %3 = arith.addf %1, %2 : vector<8x512xf32>
    %c0_4 = arith.constant 0 : index
    %c0_5 = arith.constant 0 : index
    %c0_6 = arith.constant 0 : index
    %4 = vector.load %arg4[%c0_4, %c0_5, %c0_6] : memref<1x8x512xf32, #tpu.memory_space<vmem>>, vector<1x8x512xf32>
    %5 = vector.shape_cast %4 : vector<1x8x512xf32> to vector<8x512xf32>
    %6 = vector.shape_cast %3 : vector<8x512xf32> to vector<1x8x512xf32>
    tpu.vector_store %arg4[%c0_4, %c0_5, %c0_6], %6 {strides = array<i32>} : memref<1x8x512xf32, #tpu.memory_space<vmem>>, vector<1x8x512xf32>,
    return
  }
  func.func @transform_0(%arg0: i32, %arg1: i32) -> (i32, i32, i32) {
    %c0_i32 = arith.constant 0 : i32
    %c0_i32_0 = arith.constant 0 : i32
    return %arg1, %arg0, %c0_i32 : i32, i32, i32
  }
  func.func @transform_1(%arg0: i32, %arg1: i32) -> (i32, i32) {
    %c0_i32 = arith.constant 0 : i32
    %c0_i32_0 = arith.constant 0 : i32
    return %arg0, %c0_i32 : i32, i32
  }
  func.func @transform_2(%arg0: i32, %arg1: i32) -> (i32, i32, i32) {
    %c0_i32 = arith.constant 0 : i32
    %c0_i32_0 = arith.constant 0 : i32
    return %arg1, %arg0, %c0_i32 : i32, i32, i32
  }
}

</mosaic_0001>

<bundles_post_ra>
// kernel: tpu_custom_call.1
= control target key start
LH: loop header
LB: loop body
LE: loop exit
PB: predicated region body
PF: predicated region fallthrough
CT: control target
= control target key end

     0   :  { %7 = vsyncpa [#allocation3], 0  ;;  %s739_s0 = inlined_call_operand.hbm [shape: f32[2,8,512], index: 0, kind: input, shape index: {}]   ;;  %s740_s1 = inlined_call_operand.hbm [shape: f32[8,512], index: 1, kind: input, shape index: {}]   ;;  %s741_s2 = inlined_call_operand.hbm [shape: f32[2,8,512], index: 2, kind: output, shape index: {}]  }
   0x1   :  { %9 = vsyncpa [#allocation3 + $0x1], 0 }
   0x2   :  { %10 = vsyncpa [#allocation6], 0 }
   0x3   :  { %11 = vsyncpa [#allocation4], 0 }
   0x4   :  { %13 = vsyncpa [#allocation4 + $0x1], 0  ;;  %s590_s9 = smov 0   ;;  %s592_s10 = smov 0  }
   0x5   :  { %s594_s11 = smov 0   ;;  %s596_s12 = smov 0  }
   0x6   :  { %s598_s13 = smov 0   ;;  %s600_s14 = smov 0  }
   0x7 LB: > { %s334_s15 = sadd.s32 4294967295, %s572_s14   ;;  %s335_s16 = sadd.s32 4294967294, %s572_s14   ;;  %s572_s14 = sphi %s600_s14, %s19_s14   ;;  %s568_s13 = sphi %s598_s13, %s753_s13   ;;  %s564_s12 = sphi %s596_s12, %s752_s12   ;;  %s560_s11 = sphi %s594_s11, %s751_s11   ;;  %s556_s10 = sphi %s592_s10, %s750_s10   ;;  %s552_s9 = sphi %s590_s9, %s749_s9  }
   0x8   : > { %p53_p0 = scmp.ne.s32.totalorder %s556_s10, %s552_s9  ;;  %p624_p1 = scmp.eq.s32.totalorder %s334_s15, 0 }
   0x9   : > { %p628_p2 = scmp.eq.s32.totalorder %s334_s15, 1  ;;  %p111_p3 = scmp.eq.s32.totalorder %s335_s16, 1 }
   0xa   : > { %p634_p4 = por %p624_p1, %p53_p0  ;;  %p336_p5 = scmp.ge.s32.totalorder %s572_s14, 1 }
   0xb   : > { %p639_p6 = por %p111_p3, %p53_p0  ;;  %p118_p7 = scmp.lt.s32.totalorder %s572_s14, 3 }
   0xc   : > { %s133_s23 = sshll.u32 %s740_s1, 4  ;;  %p338_p9 = scmp.ge.s32.totalorder %s572_s14, 2  ;;  %s134_s23 = int_to_ptr.hbm [resolvable:$true] %s133_s23 }
   0xd   : > { %p647_p8 = pnand %p336_p5, %p118_p7  ;;  %s574_s25 = smov [#allocation5]  }
   0xe   : > { %s135_s26 = sshll.u32 %s574_s25, 4  ;;  %s28_s27 = sadd.s32 1, %s568_s13  ;;  %s136_s26 = int_to_ptr.vmem [resolvable:$true] %s135_s26 }
   0xf   : > { %p361_p10 = pneg %p647_p8  ;;  %p29_p12 = scmp.ge.s32.totalorder %s28_s27, 2 }
  0x10   : > { %s40_s28 = sadd.s32 1, %s560_s11  ;;  %p47_p13 = scmp.ne.s32.totalorder %s560_s11, %s556_s10 }
  0x11   : > { %p362_p11 = pnand %p361_p10, %p624_p1  ;;  %p48_p0 = scmp.eq.s32.totalorder %s572_s14, 0 }
  0x12   : > { %s755_s27 = smov (%p29_p12, %s28_s27), 0  ;;  %p669_p5 = por %p628_p2, %p47_p13 }
  0x13   : > { %364 = dma.hbm_to_vmem [thread:$0]  (!%p362_p11), %s134_s23, 512, %s136_s26, [#allocation6]  }
  0x14   : > { %p663_p3 = por %p48_p0, %p47_p13  ;;  %s35_s3 = ssub.s32 %s568_s13, %s755_s27 }
  0x15   : > { %p374_p7 = scmp.lt.s32.totalorder %s572_s14, 2  ;;  %p38_p10 = scmp.eq.s32.totalorder %s35_s3, 0 }
  0x16   : > { %s146_s4 = sand.u32 1, %s560_s11   ;;  %s351_s7 = sshll.u32 %s568_s13, 5 }
  0x17   : > { %s339_s5 = sshll.u32 %s146_s4, 5  ;;  %s157_s16 = scalar_lea.hbm %s739_s0, %s351_s7 }
  0x18   : > { %s678_s6 = scalar_select %p38_p10, %s560_s11, %s40_s28  }
  0x19   : > { %s150_s21 = scalar_lea.vmem [#allocation2], %s339_s5  ;;  %s159_s18 = sshll.u32 %s157_s16, 4  ;;  %s160_s18 = int_to_ptr.hbm [resolvable:$true] %s159_s18 }
  0x1a   : > { %s161_s22 = sshll.u32 %s150_s21, 4  ;;  %p366_p2 = pnand %p374_p7, %p663_p3  ;;  %s162_s22 = int_to_ptr.vmem [resolvable:$true] %s161_s22 }
  0x1b   : > { %s147_s23 = scalar_lea.sflag [#allocation3], %s146_s4  ;;  %170 = sbr.rel (%p647_p8) target bundleno = 50 (0x32), region = 28 }
  0x1c   : > { %368 = dma.hbm_to_vmem [thread:$0]  (!%p366_p2), %s160_s18, 512, %s162_s22, %s147_s23  }
  0x1d   : > { %s689_s25 = sand.u32 (!%p647_p8), 1, %s556_s10  }
  0x1e   : > { %s343_s26 = sshll.u32 (!%p647_p8), %s689_s25, 5  ;;  %s173_s28 = scalar_lea.sflag (!%p647_p8), [#allocation3], %s689_s25 }
  0x1f   : > { %s176_s3 = scalar_lea.vmem (!%p647_p8), [#allocation2], %s343_s26 }
  0x20   : > { %539 = dma.done.wait (%p634_p4), %s173_s28, 512  }
  0x21   : > { %541 = vsyncadd (%p634_p4), %s173_s28, 4294966784 }
  0x22   : > { %543 = dma.done.wait (%p624_p1), [#allocation6], 512  }
  0x23   : > { %545 = vsyncadd (%p624_p1), [#allocation6], 4294966784  ;;  %s352_s24 = sshll.u32 %s564_s12, 5  ;;  %v203_v0 = vld [vmem:[%s176_s3] sm:$0xff]  ;;  %v204_v2 = vld [vmem:[%s176_s3 + $0x8] sm:$0xff]  ;;  %s202_s7 = scalar_lea.vmem [#allocation7], %s343_s26 }
  0x24   : > { %s233_s5 = scalar_lea.hbm %s741_s2, %s352_s24  ;;  %v207_v1 = vld [vmem:[#allocation5] sm:$0xff]  ;;  %s235_s8 = sshll.u32 %s202_s7, 4  ;;  %v208_v4 = vld [vmem:[#allocation5 + $0x8] sm:$0xff]  ;;  %v205_v5 = vld [vmem:[%s176_s3 + $0x10] sm:$0xff]  ;;  %s236_s8 = int_to_ptr.vmem [resolvable:$true] %s235_s8 }
  0x25   : > { %v211_v3 = vadd.f32 %v207_v1, %v203_v0  ;;  %v209_v6 = vld [vmem:[#allocation5 + $0x10] sm:$0xff]  ;;  %s237_s19 = sshll.u32 %s233_s5, 4  ;;  %v212_v7 = vadd.f32 %v208_v4, %v204_v2  ;;  %v206_v9 = vld [vmem:[%s176_s3 + $0x18] sm:$0xff]  ;;  %s220_s12 = scalar_lea.sflag [#allocation4], %s689_s25  ;;  %s238_s19 = int_to_ptr.hbm [resolvable:$true] %s237_s19 }
  0x26   : > { %v213_v8 = vadd.f32 %v209_v6, %v205_v5  ;;  %v210_v10 = vld [vmem:[#allocation5 + $0x18] sm:$0xff]  ;;  %s500_s17 = sshra.s32 %s238_s19, 4  ;;  %s506_s22 = scalar_lea.hbm %s741_s2, 64  ;;  %s501_s17 = int_to_ptr.hbm [resolvable:$true] %s500_s17 }
  0x27   : > { %215 = vst [vmem:[%s202_s7] sm:$0xff] %v211_v3  ;;  %v214_v11 = vadd.f32 %v210_v10, %v206_v9  ;;  %s502_s15 = scalar_lea.hbm %s501_s17, 32  ;;  %p507_p11 = scmp.lt.s32.totalorder %s501_s17, %s741_s2 }
  0x28   : > { %216 = vst [vmem:[%s202_s7 + $0x8] sm:$0xff] %v212_v7  ;;  %p503_p1 = scmp.ne.s32.totalorder %s501_s17, %s502_s15  ;;  %p508_p12 = scmp.lt.s32.totalorder %s506_s22, %s502_s15 }
  0x29   : > { %217 = vst [vmem:[%s202_s7 + $0x10] sm:$0xff] %v213_v8 }
  0x2a   : > { %218 = vst [vmem:[%s202_s7 + $0x18] sm:$0xff] %v214_v11  ;;  %p504_p4 = pnand %p503_p1, %p669_p5  ;;  %p509_p13 = por %p508_p12, %p507_p11 }
  0x2c   : > { %p505_p8 = pneg %p504_p4 }
  0x2e   : > { %p510_p0 = pnand %p509_p13, %p505_p8 }
  0x30   : > { %513 = shalt.err (!%p510_p0)
}
  0x31   : > { %359 = dma.vmem_to_hbm [thread:$0]  (%p669_p5), %s236_s8, 512, %s238_s19, %s220_s12  }
  0x32 PF: > { %s249_s25 = sand.u32 1, %s552_s9   ;;  %p370_p3 = pnand %p338_p9, %p639_p6 }
  0x33   : > { %s250_s26 = scalar_lea.sflag [#allocation4], %s249_s25 }
  0x34   : > { %p371_p7 = pneg %p370_p3 }
  0x36   : > { %547 = dma.done.wait (%p371_p7), %s250_s26, 512  }
  0x37   : > { %549 = vsyncadd (%p371_p7), %s250_s26, 4294966784  ;;  %s19_s14 = sadd.s32 1, %s572_s14   ;;  %s749_s9 = smov %s556_s10 }
  0x38   : > { %p16_p10 = scmp.ge.s32.totalorder %s19_s14, 4   ;;  %s750_s10 = smov %s560_s11 }
  0x39   : > { %s751_s11 = smov %s678_s6  ;;  %s752_s12 = smov %s568_s13 }
  0x3a   : > { %s753_s13 = smov %s755_s27  ;;  %18 = sbr.rel (!%p16_p10) target bundleno = 7 (0x7), region = 78 }
  0x3f   :  { %256 = vsyncpa [#allocation3], 1 }
  0x40   :  { %258 = vsyncpa [#allocation3 + $0x1], 1 }
  0x41   :  { %259 = vsyncpa [#allocation6], 1 }
  0x42   :  { %260 = vsyncpa [#allocation4], 1 }
  0x43   :  { %262 = vsyncpa [#allocation4 + $0x1], 1 }

</bundles_post_ra>
